<compile_context>
chip_gen: v7x
topology: tpu7x:2x2x1
jax: 0.10.0
libtpu: 0.0.40
codegen_flags: <defaults>
</compile_context>

<pallas_src>
import functools

import jax
import jax.numpy as jnp
from jax import lax
from jax.experimental import pallas as pl
from jax.experimental.pallas import tpu as pltpu

_SIGMAS = (1.0, 2.0, 4.0, 8.0, 16.0)


def _round_up(v, m):
    return (v + m - 1) // m * m


def _hsic_tri_kernel(bi_ref, bj_ref, xi_ref, nxi_ref, xj_ref, yj_ref, nxj_ref,
                     q_ref):
    """Triangular block pair t=(bi,bj), bj>=bi:
       Q[bi rows] += w * Kx_block @ yc[bj rows],  w = 2 off-diag / 1 diag."""
    t = pl.program_id(0)
    bi = bi_ref[t]
    bj = bj_ref[t]

    # First pair of every bi-run is the diagonal (bj == bi): init accumulator.
    @pl.when(bj == bi)
    def _():
        q_ref[...] = jnp.zeros_like(q_ref)

    # x_i @ x_j^T without an in-kernel transpose (contract last dims).
    dn = (((1,), (1,)), ((), ()))
    inner = lax.dot_general(xi_ref[...], xj_ref[...], dimension_numbers=dn,
                            preferred_element_type=jnp.float32)       # (tm, tn)

    # ||x_i - x_j||^2, norms precomputed in the wrapper; clamp cancellation.
    dist_sq = jnp.maximum(nxi_ref[...] + nxj_ref[...] - 2.0 * inner, 0.0)

    # Multi-sigma Gaussian kernel with ONE exp + repeated squaring:
    #   base = exp(-d/512)  (sigma=16); base^4 -> sigma=8; base^16 -> sigma=4;
    #   base^64 -> sigma=2; base^256 -> sigma=1.
    b1 = jnp.exp(dist_sq * (-1.0 / 512.0))
    b2 = b1 * b1
    b4 = b2 * b2
    b8 = b4 * b4
    b16 = b8 * b8
    b32 = b16 * b16
    b64 = b32 * b32
    b128 = b64 * b64
    b256 = b128 * b128
    kx = (b1 + b4 + b16 + b64 + b256) * (1.0 / float(len(_SIGMAS)))   # (tm, tn)

    # MXU epilogue: contribution to Q[bi rows] is Kx_block @ yc[bj rows].
    dn2 = (((1,), (0,)), ((), ()))
    contrib = lax.dot_general(kx, yj_ref[...], dimension_numbers=dn2,
                              preferred_element_type=jnp.float32)     # (tm, c)

    w = jnp.where(bj > bi, 2.0, 1.0)     # symmetry: off-diagonal pairs doubled
    q_ref[...] += w * contrib


@functools.partial(jax.jit, static_argnames=("mean_sub", "y_kernel", "block_n"))
def hsic_loss(x, y, *, mean_sub=False, y_kernel="linear", block_n=None):
    """Pallas-fused HSICLoss.forward(x, y) for the module defaults."""
    if y_kernel != "linear":
        # TODO(synk): 'rbf' y-kernel branch (Gaussian y-Gram centering does not
        # factor); the module's default path is 'linear'.
        raise NotImplementedError("only y_kernel='linear' is implemented")

    assert x.ndim == 2 and y.ndim == 2 and x.shape[0] == y.shape[0]
    n = x.shape[0]
    x = jnp.asarray(x, jnp.float32)
    y = jnp.asarray(y, jnp.float32)

    if mean_sub:
        # Literal translation of the PyTorch expression: the division binds to
        # the mean (x - mean/std), std is unbiased (torch default).
        x = x - jnp.mean(x, axis=0) / (jnp.std(x, axis=0, ddof=1) + 1e-12)
        y = y - jnp.mean(y, axis=0)

    # Fold the double-centering into y. IMPORTANT: center BEFORE zero-padding
    # (padded rows must stay exactly zero so padded contributions vanish).
    yc = y - jnp.mean(y, axis=0, keepdims=True)

    # Tile selection: single full-extent block for small N, else 512-row tiles
    # (multiple of 128 for v5e MXU; (512,512) f32 temps fit v7x's 64 MiB VMEM).
    if block_n is None:
        block_n = 512 if n > 512 else _round_up(n, 8)
    n_pad = _round_up(n, block_n)
    pad = n_pad - n
    if pad:
        x = jnp.pad(x, ((0, pad), (0, 0)))
        yc = jnp.pad(yc, ((0, pad), (0, 0)))   # zero rows -> padded terms vanish

    dx = x.shape[1]
    c = yc.shape[1]
    nb = n_pad // block_n

    # Squared row norms, computed once (O(N*dx)); column + row layouts so the
    # kernel never does a sublane->lane relayout.
    nx = jnp.sum(x * x, axis=1)
    nx_col = nx[:, None]          # (n_pad, 1)
    nx_row = nx[None, :]          # (1, n_pad)

    # Upper-triangular block pairs, row-major (so each Q[bi] output block is
    # revisited consecutively and stays resident across its bj sweep).
    pairs = [(i, j) for i in range(nb) for j in range(i, nb)]
    num_pairs = len(pairs)
    bi_arr = jnp.asarray([p[0] for p in pairs], dtype=jnp.int32)
    bj_arr = jnp.asarray([p[1] for p in pairs], dtype=jnp.int32)

    cost = pl.CostEstimate(
        flops=int(num_pairs * (2 * block_n * block_n * (dx + c)
                               + 16 * block_n * block_n)),
        transcendentals=int(num_pairs * block_n * block_n),
        bytes_accessed=int(num_pairs * 4 * block_n * (2 * dx + 2 * c + 2)
                           + 4 * n_pad * c),
    )

    q = pl.pallas_call(
        _hsic_tri_kernel,
        out_shape=jax.ShapeDtypeStruct((n_pad, c), jnp.float32),
        grid_spec=pltpu.PrefetchScalarGridSpec(
            num_scalar_prefetch=2,
            grid=(num_pairs,),
            in_specs=[
                pl.BlockSpec((block_n, dx), lambda t, bi, bj: (bi[t], 0)),  # x  rows i
                pl.BlockSpec((block_n, 1), lambda t, bi, bj: (bi[t], 0)),   # ||x_i||^2
                pl.BlockSpec((block_n, dx), lambda t, bi, bj: (bj[t], 0)),  # x  rows j
                pl.BlockSpec((block_n, c), lambda t, bi, bj: (bj[t], 0)),   # yc rows j
                pl.BlockSpec((1, block_n), lambda t, bi, bj: (0, bj[t])),   # ||x_j||^2
            ],
            out_specs=pl.BlockSpec((block_n, c), lambda t, bi, bj: (bi[t], 0)),
        ),
        compiler_params=pltpu.CompilerParams(
            # Data-dependent accumulation into the same output block across
            # consecutive steps -> must be "arbitrary".
            dimension_semantics=("arbitrary",),
            vmem_limit_bytes=48 * 1024 * 1024,
        ),
        cost_estimate=cost,
    )(bi_arr, bj_arr, x, nx_col, x, yc, nx_row)

    # Final O(N*c) contraction; padded rows of yc are zero.
    return jnp.sum(q * yc)


# ---------------- pure-JAX reference (literal PyTorch translation) ------------
def _center_ref(k):
    mean_col = jnp.mean(k, axis=0, keepdims=True)
    mean_row = jnp.mean(k, axis=1, keepdims=True)
    mean_all = jnp.mean(k)
    return k - mean_col - mean_row + mean_all


def _gaussian_ref(x, sigma):
    inner = jnp.dot(x, x.T, precision=lax.Precision.HIGHEST)
    norm = jnp.diag(inner)
    dist_sq = norm[None, :] + norm[:, None] - 2.0 * inner
    return jnp.exp(-dist_sq / (2.0 * sigma * sigma))


def hsic_ref(x, y):
    x = x.astype(jnp.float32)
    y = y.astype(jnp.float32)
    kx = sum(_gaussian_ref(x, s) for s in _SIGMAS) / float(len(_SIGMAS))
    g_x = _center_ref(kx)
    g_y = _center_ref(jnp.dot(y, y.T, precision=lax.Precision.HIGHEST))
    return jnp.trace(jnp.dot(g_x, g_y, precision=lax.Precision.HIGHEST))


if __name__ == "__main__":
    key = jax.random.PRNGKey(0)
    k1, k2, k3, k4 = jax.random.split(key, 4)

    # Small case (non-multiple-of-8 batch exercises padding; single block).
    n, d, c = 10, 32, 4
    x = jax.random.normal(k1, (n, d), dtype=jnp.float32)
    y = jax.nn.softmax(jax.random.normal(k2, (n, c), dtype=jnp.float32), axis=-1)
    out = jax.block_until_ready(hsic_loss(x, y))
    ref = hsic_ref(x, y)
    assert jnp.isfinite(out)
    assert jnp.allclose(out, ref, rtol=5e-3, atol=2e-3), (out, ref)

    # Multi-block case: force block_n=128 -> 300 padded to 384, nb=3,
    # triangular grid of 6 block pairs (exercises symmetry + data-dependent
    # index maps + off-diagonal doubling).
    n2, d2, c2 = 300, 48, 8
    x2 = jax.random.normal(k3, (n2, d2), dtype=jnp.float32)
    y2 = jax.nn.softmax(jax.random.normal(k4, (n2, c2), dtype=jnp.float32), axis=-1)
    out2 = jax.block_until_ready(hsic_loss(x2, y2, block_n=128))
    ref2 = hsic_ref(x2, y2)
    assert jnp.isfinite(out2)
    assert jnp.allclose(out2, ref2, rtol=1e-2, atol=1e-2), (out2, ref2)

    print("KERNEL_OK")
</pallas_src>

<mosaic_0001>
module attributes {stable_mosaic.version = 11 : i64} {
  func.func @_hsic_tri_kernel(%arg0: i32, %arg1: memref<1xi32, #tpu.memory_space<smem>>, %arg2: memref<1xi32, #tpu.memory_space<smem>>, %arg3: memref<16x32xf32, #tpu.memory_space<vmem>>, %arg4: memref<16x1xf32, #tpu.memory_space<vmem>>, %arg5: memref<16x32xf32, #tpu.memory_space<vmem>>, %arg6: memref<16x4xf32, #tpu.memory_space<vmem>>, %arg7: memref<1x16xf32, #tpu.memory_space<vmem>>, %arg8: memref<16x4xf32, #tpu.memory_space<vmem>>) attributes {dimension_semantics = [#tpu.dimension_semantics<arbitrary>], iteration_bounds = array<i64: 1>, scalar_prefetch = 2 : i64, scratch_operands = 0 : i64, tpu.core_type = #tpu.core_type<tc>, window_params = [{transform_indices = @transform_0, window_bounds = array<i64: 16, 32>}, {transform_indices = @transform_1, window_bounds = array<i64: 16, 1>}, {transform_indices = @transform_2, window_bounds = array<i64: 16, 32>}, {transform_indices = @transform_3, window_bounds = array<i64: 16, 4>}, {transform_indices = @transform_4, window_bounds = array<i64: 1, 16>}, {transform_indices = @transform_5, window_bounds = array<i64: 16, 4>}]} {
    %0 = arith.index_cast %arg0 : i32 to index
    %1 = memref.load %arg1[%0] : memref<1xi32, #tpu.memory_space<smem>>
    %2 = arith.index_cast %arg0 : i32 to index
    %3 = memref.load %arg2[%2] : memref<1xi32, #tpu.memory_space<smem>>
    %4 = arith.cmpi eq, %3, %1 : i32
    %5 = arith.extui %4 : i1 to i32
    %c0_i32 = arith.constant 0 : i32
    %6 = arith.cmpi ne, %5, %c0_i32 : i32
    scf.if %6 {
      %cst_20 = arith.constant 0.000000e+00 : f32
      %46 = vector.broadcast %cst_20 : f32 to vector<16x4xf32>
      %c0_21 = arith.constant 0 : index
      %c0_22 = arith.constant 0 : index
      %47 = vector.load %arg8[%c0_21, %c0_22] : memref<16x4xf32, #tpu.memory_space<vmem>>, vector<16x4xf32>
      tpu.vector_store %arg8[%c0_21, %c0_22], %46 {strides = array<i32>} : memref<16x4xf32, #tpu.memory_space<vmem>>, vector<16x4xf32>,
    } else {
    }
    %c0 = arith.constant 0 : index
    %c0_0 = arith.constant 0 : index
    %7 = vector.load %arg3[%c0, %c0_0] : memref<16x32xf32, #tpu.memory_space<vmem>>, vector<16x32xf32>
    %c0_1 = arith.constant 0 : index
    %c0_2 = arith.constant 0 : index
    %8 = vector.load %arg5[%c0_1, %c0_2] : memref<16x32xf32, #tpu.memory_space<vmem>>, vector<16x32xf32>
    %cst = arith.constant dense<0.000000e+00> : vector<16x16xf32>
    %9 = tpu.matmul %7, %8, %cst {dimension_numbers = #tpu.dot_dimension_numbers<[1], [1], [0], [0], [0, 0, 1, 0], [], []>} : vector<16x32xf32>, vector<16x32xf32>, vector<16x16xf32> -> vector<16x16xf32>
    %c0_3 = arith.constant 0 : index
    %c0_4 = arith.constant 0 : index
    %10 = vector.load %arg4[%c0_3, %c0_4] : memref<16x1xf32, #tpu.memory_space<vmem>>, vector<16x1xf32>
    %c0_5 = arith.constant 0 : index
    %c0_6 = arith.constant 0 : index
    %11 = vector.load %arg7[%c0_5, %c0_6] : memref<1x16xf32, #tpu.memory_space<vmem>>, vector<1x16xf32>
    %12 = vector.broadcast %10 : vector<16x1xf32> to vector<16x16xf32>
    %13 = vector.broadcast %11 : vector<1x16xf32> to vector<16x16xf32>
    %14 = arith.addf %12, %13 : vector<16x16xf32>
    %cst_7 = arith.constant 2.000000e+00 : f32
    %15 = vector.broadcast %cst_7 : f32 to vector<16x16xf32>
    %16 = arith.mulf %15, %9 : vector<16x16xf32>
    %17 = arith.subf %14, %16 : vector<16x16xf32>
    %cst_8 = arith.constant 0.000000e+00 : f32
    %18 = vector.broadcast %cst_8 : f32 to vector<16x16xf32>
    %19 = arith.maximumf %17, %18 : vector<16x16xf32>
    %cst_9 = arith.constant -0.001953125 : f32
    %20 = vector.broadcast %cst_9 : f32 to vector<16x16xf32>
    %21 = arith.mulf %19, %20 : vector<16x16xf32>
    %22 = math.exp %21 : vector<16x16xf32>
    %23 = arith.mulf %22, %22 : vector<16x16xf32>
    %24 = arith.mulf %23, %23 : vector<16x16xf32>
    %25 = arith.mulf %24, %24 : vector<16x16xf32>
    %26 = arith.mulf %25, %25 : vector<16x16xf32>
    %27 = arith.mulf %26, %26 : vector<16x16xf32>
    %28 = arith.mulf %27, %27 : vector<16x16xf32>
    %29 = arith.mulf %28, %28 : vector<16x16xf32>
    %30 = arith.mulf %29, %29 : vector<16x16xf32>
    %31 = arith.addf %22, %24 : vector<16x16xf32>
    %32 = arith.addf %31, %26 : vector<16x16xf32>
    %33 = arith.addf %32, %28 : vector<16x16xf32>
    %34 = arith.addf %33, %30 : vector<16x16xf32>
    %cst_10 = arith.constant 2.000000e-01 : f32
    %35 = vector.broadcast %cst_10 : f32 to vector<16x16xf32>
    %36 = arith.mulf %34, %35 : vector<16x16xf32>
    %c0_11 = arith.constant 0 : index
    %c0_12 = arith.constant 0 : index
    %37 = vector.load %arg6[%c0_11, %c0_12] : memref<16x4xf32, #tpu.memory_space<vmem>>, vector<16x4xf32>
    %cst_13 = arith.constant dense<0.000000e+00> : vector<16x4xf32>
    %38 = tpu.matmul %36, %37, %cst_13 {dimension_numbers = #tpu.dot_dimension_numbers<[1], [0], [0], [1], [0, 0, 1, 1], [], []>} : vector<16x16xf32>, vector<16x4xf32>, vector<16x4xf32> -> vector<16x4xf32>
    %39 = arith.cmpi sgt, %3, %1 : i32
    %cst_14 = arith.constant 2.000000e+00 : f32
    %cst_15 = arith.constant 1.000000e+00 : f32
    %40 = arith.select %39, %cst_14, %cst_15 : f32
    %c0_16 = arith.constant 0 : index
    %c0_17 = arith.constant 0 : index
    %41 = vector.load %arg8[%c0_16, %c0_17] : memref<16x4xf32, #tpu.memory_space<vmem>>, vector<16x4xf32>
    %42 = vector.broadcast %40 : f32 to vector<16x4xf32>
    %43 = arith.mulf %42, %38 : vector<16x4xf32>
    %44 = arith.addf %41, %43 : vector<16x4xf32>
    %c0_18 = arith.constant 0 : index
    %c0_19 = arith.constant 0 : index
    %45 = vector.load %arg8[%c0_18, %c0_19] : memref<16x4xf32, #tpu.memory_space<vmem>>, vector<16x4xf32>
    tpu.vector_store %arg8[%c0_18, %c0_19], %44 {strides = array<i32>} : memref<16x4xf32, #tpu.memory_space<vmem>>, vector<16x4xf32>,
    return
  }
  func.func @transform_0(%arg0: i32, %arg1: memref<1xi32, #tpu.memory_space<smem>>, %arg2: memref<1xi32, #tpu.memory_space<smem>>) -> (i32, i32) {
    %0 = arith.index_cast %arg0 : i32 to index
    %1 = memref.load %arg1[%0] : memref<1xi32, #tpu.memory_space<smem>>
    %c0_i32 = arith.constant 0 : i32
    %c0_i32_0 = arith.constant 0 : i32
    return %1, %c0_i32 : i32, i32
  }
  func.func @transform_1(%arg0: i32, %arg1: memref<1xi32, #tpu.memory_space<smem>>, %arg2: memref<1xi32, #tpu.memory_space<smem>>) -> (i32, i32) {
    %0 = arith.index_cast %arg0 : i32 to index
    %1 = memref.load %arg1[%0] : memref<1xi32, #tpu.memory_space<smem>>
    %c0_i32 = arith.constant 0 : i32
    %c0_i32_0 = arith.constant 0 : i32
    return %1, %c0_i32 : i32, i32
  }
  func.func @transform_2(%arg0: i32, %arg1: memref<1xi32, #tpu.memory_space<smem>>, %arg2: memref<1xi32, #tpu.memory_space<smem>>) -> (i32, i32) {
    %0 = arith.index_cast %arg0 : i32 to index
    %1 = memref.load %arg2[%0] : memref<1xi32, #tpu.memory_space<smem>>
    %c0_i32 = arith.constant 0 : i32
    %c0_i32_0 = arith.constant 0 : i32
    return %1, %c0_i32 : i32, i32
  }
  func.func @transform_3(%arg0: i32, %arg1: memref<1xi32, #tpu.memory_space<smem>>, %arg2: memref<1xi32, #tpu.memory_space<smem>>) -> (i32, i32) {
    %0 = arith.index_cast %arg0 : i32 to index
    %1 = memref.load %arg2[%0] : memref<1xi32, #tpu.memory_space<smem>>
    %c0_i32 = arith.constant 0 : i32
    %c0_i32_0 = arith.constant 0 : i32
    return %1, %c0_i32 : i32, i32
  }
  func.func @transform_4(%arg0: i32, %arg1: memref<1xi32, #tpu.memory_space<smem>>, %arg2: memref<1xi32, #tpu.memory_space<smem>>) -> (i32, i32) {
    %0 = arith.index_cast %arg0 : i32 to index
    %1 = memref.load %arg2[%0] : memref<1xi32, #tpu.memory_space<smem>>
    %c0_i32 = arith.constant 0 : i32
    %c0_i32_0 = arith.constant 0 : i32
    return %c0_i32, %1 : i32, i32
  }
  func.func @transform_5(%arg0: i32, %arg1: memref<1xi32, #tpu.memory_space<smem>>, %arg2: memref<1xi32, #tpu.memory_space<smem>>) -> (i32, i32) {
    %0 = arith.index_cast %arg0 : i32 to index
    %1 = memref.load %arg1[%0] : memref<1xi32, #tpu.memory_space<smem>>
    %c0_i32 = arith.constant 0 : i32
    %c0_i32_0 = arith.constant 0 : i32
    return %1, %c0_i32 : i32, i32
  }
}

</mosaic_0001>

<bundles_post_ra>
// kernel: hsic_loss.1
= control target key start
LH: loop header
LB: loop body
LE: loop exit
PB: predicated region body
PF: predicated region fallthrough
CT: control target
= control target key end

     0   :  { %s610_s0 = inlined_call_operand.<no memory space> [shape: s32[1], index: 0, kind: input, shape index: {}, may-alias: {0,1}]   ;;  %s611_s1 = inlined_call_operand.<no memory space> [shape: s32[1], index: 1, kind: input, shape index: {}, may-alias: {0,1}]   ;;  %s612_s2 = inlined_call_operand.vmem [shape: f32[16,32], index: 2, kind: input, shape index: {}, may-alias: {2,4}]   ;;  %s613_s3 = inlined_call_operand.vmem [shape: f32[16,1], index: 3, kind: input, shape index: {}]   ;;  %s614_s7 = inlined_call_operand.vmem [shape: f32[16,4], index: 7, kind: output, shape index: {}]   ;;  %s615_s4 = inlined_call_operand.vmem [shape: f32[16,32], index: 4, kind: input, shape index: {}, may-alias: {2,4}]   ;;  %s616_s5 = inlined_call_operand.vmem [shape: f32[16,4], index: 5, kind: input, shape index: {}]   ;;  %s617_s6 = inlined_call_operand.vmem [shape: f32[1,16], index: 6, kind: input, shape index: {}]  }
   0x1   :  { %s449_s26 = sshll.u32 %s610_s0, 1  ;;  %s453_s29 = sshll.u32 %s611_s1, 1 }
   0x2   :  { %p97_p0 = scmp.lt.s32.totalorder %s449_s26, 1  ;;  %p113_p1 = scmp.lt.s32.totalorder %s453_s29, 1 }
   0x3   :  { %p128_p2 = scmp.lt.s32.totalorder %s611_s1, 0  ;;  %p459_p3 = scmp.ne.s32.totalorder %s611_s1, %s610_s0 }
   0x4   :  { %s619_s26 = smov (!%p97_p0, %s449_s26), 1  ;;  %s621_s29 = smov (!%p113_p1, %s453_s29), 1 }
   0x5   :  { %s450_s30 = sshll.u32 %s619_s26, 3  ;;  %s454_s16 = sshll.u32 %s621_s29, 3  ;;  %vm146_vm0 = vcmask (!%p459_p3), 31744   ;;  %v506_v0 = vmov (!%p459_p3), 0.0  }
   0x6   :  { %s560_s12 = scalar_lea.vmem %s612_s2, %s450_s30  ;;  %s108_s15 = scalar_lea.vmem %s613_s3, %s450_s30 }
   0x7   :  { %s568_s19 = scalar_lea.vmem %s614_s7, %s450_s30  ;;  %s116_s22 = scalar_lea.vmem %s615_s4, %s454_s16 }
   0x8   :  { %s124_s25 = scalar_lea.vmem %s616_s5, %s454_s16  ;;  %145 = sbr.rel (%p459_p3) target bundleno = 15 (0xf), region = 25  ;;  %147 = vst.msk [vmem:[%s568_s19] sm:$0xff] (!%p459_p3), %vm146_vm0, %v506_v0  ;;  %148 = vst.msk [vmem:[%s568_s19 + $0x8] sm:$0xff] (!%p459_p3), %vm146_vm0, %v506_v0 }
   0x9   :  { %s579_s27 = scalar_select %p128_p2, %s611_s1, 0 }
   0xb   :  { %s130_s29 = scalar_lea.vmem %s617_s6, %s579_s27 }
   0xf PF:  { %v151_v1 = vld [vmem:[%s116_s22] sm:$0xff]  ;;  %v152_v2 = vld [vmem:[%s116_s22 + $0x8] sm:$0xff]  ;;  %vm153_vm1 = vcmask 261120   ;;  %v507_v5 = vmov 0   ;;  %vm302_vm3 = vcmask 130048   ;;  %p384_p4 = scmp.gt.s32.totalorder %s611_s1, %s610_s0  ;;  %vm393_vm4 = vcmask 31744  }
  0x10   :  { %v149_v3 = vld [vmem:[%s560_s12] sm:$0xff]  ;;  %v489_v4 = vpack.c.bf16 %v152_v2, %v151_v1  ;;  %vm490_vm2 = vmpackc.low %vm153_vm1, %vm153_vm1  ;;  %501 = vset.pattern.permute.xlu0 %v507_v5  ;;  %v242_v7 = vld [vmem:[%s108_s15 + $0x8] sm:$0xff] }
  0x11   :  { %479 = vmatprep.mubr.msk.f32.mxu0 %vm153_vm1, %v149_v3  ;;  %v241_v6 = vld [vmem:[%s108_s15] sm:$0xff]  ;;  %v150_v8 = vld [vmem:[%s560_s12 + $0x8] sm:$0xff]  ;;  %s385_s13 = scalar_select %p384_p4, 2.0, 1.0 }
  0x12   :  { %246 = vperm.xlu0 %501, %v241_v6   ;;  %491 = vmatprep.subr.msk.bf16.mxu0 %vm490_vm2, %v489_v4  ;;  %v300_v9 = vld [vmem:[%s124_s25] sm:$0xff]  ;;  %v301_v10 = vld [vmem:[%s124_s25 + $0x8] sm:$0xff] }
  0x13   :  { %494 = vmatpush3.bf16.xpose.msk.msra.mxu0 %vm490_vm2, %v489_v4  ;;  %v495_v11 = vpack.c.bf16 %v301_v10, %v300_v9  ;;  %v464_v13 = vld [vmem:[%s130_s29] ss:$0 sm:$0xff]  ;;  %v388_v57 = vstv %s385_s13  ;;  %v387_v62 = vld [vmem:[%s568_s19 + $0x8] sm:$0xff] }
  0x14   :  { %v386_v61 = vld [vmem:[%s568_s19] sm:$0xff] }
  0x15   :  { %496 = vmatprep.subr.bf16.mxu1 %v495_v11 }
  0x16   :  { %251 = vperm.xlu0 %501, %v242_v7   ;;  %498 = vmatpush3.bf16.msra.mxu1 %v495_v11 }
  0x1a   :  { %480 = vmatmul.mubr.msk.f32.vlgmr.msra.gmra.mrb[0].mxu0 %vm153_vm1, %v150_v8 }
  0x91   :  { %v247_v12 = vpop.permute.xlu0 %246 }
  0x92   :  { %v260_v19 = vadd.f32 %v464_v13, %v247_v12 }
  0x95   :  { %v252_v14 = vpop.permute.xlu0 %251 }
  0x96   :  { %v261_v16 = vadd.f32 %v464_v13, %v252_v14 }
  0xed   :  { %v481_v15 = vpop.f32.mrb[0].mxu0 }
  0xee   :  { %v263_v17 = vmul.f32 2.0, %v481_v15  ;;  %v232_v18 = vpop.f32.mrb[1].mxu0 }
  0xef   :  { %v262_v20 = vmul.f32 2.0, %v232_v18 }
  0xf0   :  { %v265_v21 = vsub.f32 %v261_v16, %v263_v17 }
  0xf1   :  { %v264_v22 = vsub.f32 %v260_v19, %v262_v20 }
  0xf2   :  { %v267_v23 = vmax.f32 %v265_v21, 0.0 }
  0xf3   :  { %v266_v24 = vmax.f32 %v264_v22, 0.0 }
  0xf4   :  { %v269_v25 = vmul.f32 -0.001953125, %v267_v23 }
  0xf5   :  { %v268_v26 = vmul.f32 -0.001953125, %v266_v24 }
  0xf6   :  { %v272_v27 = vmul.f32 1.442695, %v269_v25 }
  0xf7   :  { %v270_v28 = vmul.f32 1.442695, %v268_v26 }
  0xf8   :  { %502 = vpow2.f32 %v272_v27 }
  0xf9   :  { %504 = vpow2.f32 %v270_v28 }
 0x102   :  { %v503_v29 = vpop.eup %502 }
 0x103   :  { %v505_v30 = vpop.eup %504  ;;  %v275_v31 = vmul.f32 %v503_v29, %v503_v29 }
 0x104   :  { %v274_v32 = vmul.f32 %v505_v30, %v505_v30 }
 0x105   :  { %v277_v33 = vmul.f32 %v275_v31, %v275_v31 }
 0x106   :  { %v276_v34 = vmul.f32 %v274_v32, %v274_v32 }
 0x107   :  { %v279_v35 = vmul.f32 %v277_v33, %v277_v33  ;;  %v291_v42 = vadd.f32 %v503_v29, %v277_v33 }
 0x108   :  { %v278_v36 = vmul.f32 %v276_v34, %v276_v34  ;;  %v290_v44 = vadd.f32 %v505_v30, %v276_v34 }
 0x109   :  { %v281_v37 = vmul.f32 %v279_v35, %v279_v35 }
 0x10a   :  { %v280_v38 = vmul.f32 %v278_v36, %v278_v36 }
 0x10b   :  { %v283_v39 = vmul.f32 %v281_v37, %v281_v37  ;;  %v293_v46 = vadd.f32 %v291_v42, %v281_v37 }
 0x10c   :  { %v282_v40 = vmul.f32 %v280_v38, %v280_v38  ;;  %v292_v48 = vadd.f32 %v290_v44, %v280_v38 }
 0x10d   :  { %v285_v41 = vmul.f32 %v283_v39, %v283_v39 }
 0x10e   :  { %v284_v43 = vmul.f32 %v282_v40, %v282_v40 }
 0x10f   :  { %v287_v45 = vmul.f32 %v285_v41, %v285_v41  ;;  %v295_v50 = vadd.f32 %v293_v46, %v285_v41 }
 0x110   :  { %v286_v47 = vmul.f32 %v284_v43, %v284_v43  ;;  %v294_v52 = vadd.f32 %v292_v48, %v284_v43 }
 0x111   :  { %v289_v49 = vmul.f32 %v287_v45, %v287_v45 }
 0x112   :  { %v288_v51 = vmul.f32 %v286_v47, %v286_v47 }
 0x113   :  { %v297_v53 = vadd.f32 %v295_v50, %v289_v49 }
 0x114   :  { %v296_v54 = vadd.f32 %v294_v52, %v288_v51 }
 0x115   :  { %v299_v56 = vmul.f32 0.2, %v297_v53 }
 0x116   :  { %v298_v55 = vmul.f32 0.2, %v296_v54 }
 0x118   :  { %486 = vmatprep.mubr.msk.f32.mxu1 %vm302_vm3, %v298_v55 }
 0x119   :  { %487 = vmatmul.mubr.msk.f32.vlgmr.msra.gmra.mrb[0].mxu1 %vm302_vm3, %v299_v56 }
 0x1ec   :  { %v488_v58 = vpop.f32.mrb[0].mxu1 }
 0x1ed   :  { %v390_v59 = vmul.f32 %v488_v58, %v388_v57  ;;  %v375_v60 = vpop.f32.mrb[1].mxu1 }
 0x1ee   :  { %v389_v63 = vmul.f32 %v388_v57, %v375_v60 }
 0x1ef   :  { %v392_v1 = vadd.f32 %v390_v59, %v387_v62 }
 0x1f0   :  { %v391_v0 = vadd.f32 %v389_v63, %v386_v61 }
 0x1f1   :  { %395 = vst.msk [vmem:[%s568_s19 + $0x8] sm:$0xff] %vm393_vm4, %v392_v1 }
 0x1f2   :  { %394 = vst.msk [vmem:[%s568_s19] sm:$0xff] %vm393_vm4, %v391_v0 }

</bundles_post_ra>
